<compile_context>
chip_gen: v6e
topology: v6e:2x2x1
jax: 0.10.0
libtpu: 0.0.40
codegen_flags: <defaults>
</compile_context>

<pallas_src>
import functools

import jax
import jax.numpy as jnp
from jax.experimental import pallas as pl
from jax.experimental.pallas import tpu as pltpu


def _ensemble_kernel(x_ref, w1_ref, b1_ref, w2_ref, b2_ref, w3_ref, b3_ref,
                     out_ref, *, act_limit):
    """3 dependent matmuls on head-fused / block-diagonal weights."""
    x = x_ref[...]                                                    # (B, in)
    h = jnp.dot(x, w1_ref[...], preferred_element_type=jnp.float32)   # (B, H*h1)
    h = jnp.maximum(h + b1_ref[...], 0.0)
    h = jnp.dot(h, w2_ref[...], preferred_element_type=jnp.float32)   # (B, H*h2)
    h = jnp.maximum(h + b2_ref[...], 0.0)
    o = jnp.dot(h, w3_ref[...], preferred_element_type=jnp.float32)   # (B, H*act)
    o = o + b3_ref[...]
    out_ref[...] = (jnp.tanh(o) * act_limit).astype(out_ref.dtype)


def _block_diag(blocks):
    """(H, r, c) stacked blocks -> (H*r, H*c) block-diagonal matrix."""
    H, r, c = blocks.shape
    out = jnp.zeros((H * r, H * c), blocks.dtype)
    for i in range(H):
        out = out.at[i * r:(i + 1) * r, i * c:(i + 1) * c].set(blocks[i])
    return out


def fuse_params(params):
    """One-time re-layout of the stacked per-head weights (hoisted out of the
    per-step forward path).  Layer 1 is fused head-major along lanes; layers
    2/3 become block-diagonal so the whole ensemble is 3 matmuls."""
    w1, b1 = params["w1"], params["b1"]          # (H,in,h1), (H,1,h1)
    w2, b2 = params["w2"], params["b2"]          # (H,h1,h2), (H,1,h2)
    w3, b3 = params["w3"], params["b3"]          # (H,h2,act), (H,1,act)
    H, in_f, h1 = w1.shape
    _, _, h2 = w2.shape
    _, _, act_dim = w3.shape
    return {
        "w1_all": jnp.transpose(w1, (1, 0, 2)).reshape(in_f, H * h1),
        "b1_all": b1.reshape(1, H * h1),
        "w2_bd": _block_diag(w2),                # (H*h1, H*h2)
        "b2_all": b2.reshape(1, H * h2),
        "w3_bd": _block_diag(w3),                # (H*h2, H*act_dim)
        "b3_all": b3.reshape(1, H * act_dim),
        "num_heads": int(H),
        "act_dim": int(act_dim),
        "in_features": int(in_f),
    }


def policy_ensemble_forward(x, fused, act_limit, *, batch_block=256):
    """x: (batch, in_features) f32; fused: output of fuse_params().
    Returns (batch, num_heads, act_dim) f32, matching the PyTorch module."""
    w1, b1 = fused["w1_all"], fused["b1_all"]
    w2, b2 = fused["w2_bd"], fused["b2_all"]
    w3, b3 = fused["w3_bd"], fused["b3_all"]
    H, act_dim, in_f = fused["num_heads"], fused["act_dim"], fused["in_features"]
    B = x.shape[0]

    kernel = functools.partial(_ensemble_kernel, act_limit=float(act_limit))
    out_shape = jax.ShapeDtypeStruct((B, H * act_dim), jnp.float32)

    # Large batches: grid over rows, marked "parallel" so both v7x TensorCores
    # split the work (and VMEM stays bounded for arbitrarily large B).
    use_grid = (B % batch_block == 0) and (B // batch_block >= 2)
    if use_grid:
        def resident(a):  # full-array block, same index every step -> stays in VMEM
            return pl.BlockSpec(a.shape, lambda i: (0, 0))
        out_flat = pl.pallas_call(
            kernel,
            out_shape=out_shape,
            grid=(B // batch_block,),
            in_specs=[pl.BlockSpec((batch_block, in_f), lambda i: (i, 0)),
                      resident(w1), resident(b1),
                      resident(w2), resident(b2),
                      resident(w3), resident(b3)],
            out_specs=pl.BlockSpec((batch_block, H * act_dim), lambda i: (i, 0)),
            compiler_params=pltpu.CompilerParams(
                dimension_semantics=("parallel",)),
        )(x, w1, b1, w2, b2, w3, b3)
    else:
        # Small batch: single invocation, everything resident in VMEM (~100 KB).
        vmem_spec = pl.BlockSpec(memory_space=pltpu.MemorySpace.VMEM)
        out_flat = pl.pallas_call(
            kernel,
            out_shape=out_shape,
            in_specs=[vmem_spec] * 7,
            out_specs=vmem_spec,
        )(x, w1, b1, w2, b2, w3, b3)

    # Free reshape (no transpose, no extra HBM copy): (B, H*act) -> (B, H, act).
    return out_flat.reshape(B, H, act_dim)


def init_params(key, num_heads, in_features, hidden_sizes, act_dim):
    """Deterministic synthetic init (uniform, PyTorch-Linear-style bounds)."""
    h1, h2 = hidden_sizes
    dims = [(in_features, h1), (h1, h2), (h2, act_dim)]
    params = {}
    for li, (fan_in, fan_out) in enumerate(dims, start=1):
        key, kw, kb = jax.random.split(key, 3)
        bound = 1.0 / jnp.sqrt(fan_in)
        params[f"w{li}"] = jax.random.uniform(
            kw, (num_heads, fan_in, fan_out), jnp.float32, -bound, bound)
        params[f"b{li}"] = jax.random.uniform(
            kb, (num_heads, 1, fan_out), jnp.float32, -bound, bound)
    return params


def reference_forward(x, params, act_limit):
    """Pure-JAX reference on the raw (unfused) stacked parameters."""
    h = jnp.maximum(jnp.einsum("bi,hio->hbo", x, params["w1"]) + params["b1"], 0.0)
    h = jnp.maximum(jnp.einsum("hbi,hio->hbo", h, params["w2"]) + params["b2"], 0.0)
    o = jnp.tanh(jnp.einsum("hbi,hio->hbo", h, params["w3"]) + params["b3"]) * act_limit
    return jnp.transpose(o, (1, 0, 2))


if __name__ == "__main__":
    # Small, module-consistent shapes.
    batch = 4
    in_features = 16
    hidden_sizes = (64, 32)
    act_dim = 4
    num_heads = 3
    act_limit = 2.0  # action_space.high[0]

    key = jax.random.PRNGKey(0)
    key, kx, kx_big = jax.random.split(key, 3)
    params = init_params(key, num_heads, in_features, hidden_sizes, act_dim)
    fused = fuse_params(params)  # ONE-TIME re-layout, outside the step path.

    # 1) Small batch: single-invocation, all-in-VMEM path.
    x = jax.random.normal(kx, (batch, in_features), jnp.float32)
    out = jax.block_until_ready(policy_ensemble_forward(x, fused, act_limit))
    ref = reference_forward(x, params, act_limit)
    assert out.shape == (batch, num_heads, act_dim), out.shape
    assert jnp.allclose(out, ref, atol=1e-5, rtol=1e-5), "mismatch vs reference (small B)"

    # 2) Larger batch: exercises the batch grid (2 row blocks, parallel axis).
    x_big = jax.random.normal(kx_big, (512, in_features), jnp.float32)
    out_big = jax.block_until_ready(policy_ensemble_forward(x_big, fused, act_limit))
    ref_big = reference_forward(x_big, params, act_limit)
    assert out_big.shape == (512, num_heads, act_dim), out_big.shape
    assert jnp.allclose(out_big, ref_big, atol=1e-5, rtol=1e-5), "mismatch vs reference (big B)"

    print("KERNEL_OK")
</pallas_src>

<mosaic_0001>
module attributes {stable_mosaic.version = 11 : i64} {
  func.func @_ensemble_kernel(%arg0: memref<4x16xf32, #tpu.memory_space<vmem>>, %arg1: memref<16x192xf32, #tpu.memory_space<vmem>>, %arg2: memref<1x192xf32, #tpu.memory_space<vmem>>, %arg3: memref<192x96xf32, #tpu.memory_space<vmem>>, %arg4: memref<1x96xf32, #tpu.memory_space<vmem>>, %arg5: memref<96x12xf32, #tpu.memory_space<vmem>>, %arg6: memref<1x12xf32, #tpu.memory_space<vmem>>, %arg7: memref<4x12xf32, #tpu.memory_space<vmem>>) attributes {dimension_semantics = [], scalar_prefetch = 0 : i64, scratch_operands = 0 : i64, tpu.core_type = #tpu.core_type<tc>} {
    %c0 = arith.constant 0 : index
    %c0_0 = arith.constant 0 : index
    %0 = vector.load %arg0[%c0, %c0_0] : memref<4x16xf32, #tpu.memory_space<vmem>>, vector<4x16xf32>
    %c0_1 = arith.constant 0 : index
    %c0_2 = arith.constant 0 : index
    %1 = vector.load %arg1[%c0_1, %c0_2] : memref<16x192xf32, #tpu.memory_space<vmem>>, vector<16x192xf32>
    %cst = arith.constant dense<0.000000e+00> : vector<4x192xf32>
    %2 = tpu.matmul %0, %1, %cst {dimension_numbers = #tpu.dot_dimension_numbers<[1], [0], [0], [1], [0, 0, 1, 1], [], []>} : vector<4x16xf32>, vector<16x192xf32>, vector<4x192xf32> -> vector<4x192xf32>
    %c0_3 = arith.constant 0 : index
    %c0_4 = arith.constant 0 : index
    %3 = vector.load %arg2[%c0_3, %c0_4] : memref<1x192xf32, #tpu.memory_space<vmem>>, vector<1x192xf32>
    %4 = vector.broadcast %3 : vector<1x192xf32> to vector<4x192xf32>
    %5 = arith.addf %2, %4 : vector<4x192xf32>
    %cst_5 = arith.constant 0.000000e+00 : f32
    %6 = vector.broadcast %cst_5 : f32 to vector<4x192xf32>
    %7 = arith.maximumf %5, %6 : vector<4x192xf32>
    %c0_6 = arith.constant 0 : index
    %c0_7 = arith.constant 0 : index
    %8 = vector.load %arg3[%c0_6, %c0_7] : memref<192x96xf32, #tpu.memory_space<vmem>>, vector<192x96xf32>
    %cst_8 = arith.constant dense<0.000000e+00> : vector<4x96xf32>
    %9 = tpu.matmul %7, %8, %cst_8 {dimension_numbers = #tpu.dot_dimension_numbers<[1], [0], [0], [1], [0, 0, 1, 1], [], []>} : vector<4x192xf32>, vector<192x96xf32>, vector<4x96xf32> -> vector<4x96xf32>
    %c0_9 = arith.constant 0 : index
    %c0_10 = arith.constant 0 : index
    %10 = vector.load %arg4[%c0_9, %c0_10] : memref<1x96xf32, #tpu.memory_space<vmem>>, vector<1x96xf32>
    %11 = vector.broadcast %10 : vector<1x96xf32> to vector<4x96xf32>
    %12 = arith.addf %9, %11 : vector<4x96xf32>
    %cst_11 = arith.constant 0.000000e+00 : f32
    %13 = vector.broadcast %cst_11 : f32 to vector<4x96xf32>
    %14 = arith.maximumf %12, %13 : vector<4x96xf32>
    %c0_12 = arith.constant 0 : index
    %c0_13 = arith.constant 0 : index
    %15 = vector.load %arg5[%c0_12, %c0_13] : memref<96x12xf32, #tpu.memory_space<vmem>>, vector<96x12xf32>
    %cst_14 = arith.constant dense<0.000000e+00> : vector<4x12xf32>
    %16 = tpu.matmul %14, %15, %cst_14 {dimension_numbers = #tpu.dot_dimension_numbers<[1], [0], [0], [1], [0, 0, 1, 1], [], []>} : vector<4x96xf32>, vector<96x12xf32>, vector<4x12xf32> -> vector<4x12xf32>
    %c0_15 = arith.constant 0 : index
    %c0_16 = arith.constant 0 : index
    %17 = vector.load %arg6[%c0_15, %c0_16] : memref<1x12xf32, #tpu.memory_space<vmem>>, vector<1x12xf32>
    %18 = vector.broadcast %17 : vector<1x12xf32> to vector<4x12xf32>
    %19 = arith.addf %16, %18 : vector<4x12xf32>
    %20 = math.tanh %19 : vector<4x12xf32>
    %cst_17 = arith.constant 2.000000e+00 : f32
    %21 = vector.broadcast %cst_17 : f32 to vector<4x12xf32>
    %22 = arith.mulf %20, %21 : vector<4x12xf32>
    %c0_18 = arith.constant 0 : index
    %c0_19 = arith.constant 0 : index
    %23 = vector.load %arg7[%c0_18, %c0_19] : memref<4x12xf32, #tpu.memory_space<vmem>>, vector<4x12xf32>
    tpu.vector_store %arg7[%c0_18, %c0_19], %22 {strides = array<i32>} : memref<4x12xf32, #tpu.memory_space<vmem>>, vector<4x12xf32>,
    return
  }
}

</mosaic_0001>

<bundles_post_ra>
// kernel: tpu_custom_call.1
= control target key start
LH: loop header
LB: loop body
LE: loop exit
PB: predicated region body
PF: predicated region fallthrough
CT: control target
= control target key end

     0   :  { %12 = vsyncpa [#allocation3], 0  ;;  %s600_s0 = inlined_call_operand.vmem [shape: f32[4,16], index: 0, kind: input, shape index: {}]   ;;  %s601_s1 = inlined_call_operand.vmem [shape: f32[16,192], index: 1, kind: input, shape index: {}]   ;;  %s602_s2 = inlined_call_operand.vmem [shape: f32[1,192], index: 2, kind: input, shape index: {}]   ;;  %s603_s3 = inlined_call_operand.hbm [shape: f32[192,96], index: 3, kind: input, shape index: {}]   ;;  %s604_s4 = inlined_call_operand.vmem [shape: f32[1,96], index: 4, kind: input, shape index: {}]   ;;  %s605_s5 = inlined_call_operand.vmem [shape: f32[96,12], index: 5, kind: input, shape index: {}]   ;;  %s606_s6 = inlined_call_operand.vmem [shape: f32[1,12], index: 6, kind: input, shape index: {}]   ;;  %s607_s7 = inlined_call_operand.hbm [shape: f32[4,12], index: 7, kind: output, shape index: {}]  }
   0x1   :  { %13 = vsyncpa [#allocation4], 0  ;;  %s450_s24 = smov [#allocation2]  }
   0x2   :  { %s25_s25 = sshll.u32 %s450_s24, 4  ;;  %s26_s25 = int_to_ptr.vmem [resolvable:$true] %s25_s25 }
   0x3   :  { %s414_s26 = scalar_lea.vmem %s26_s25, 3072  ;;  %p419_p1 = scmp.lt.s32.totalorder %s26_s25, %s26_s25 }
   0x4   :  { %p415_p0 = scmp.ne.s32.totalorder %s26_s25, %s414_s26  ;;  %p420_p2 = scmp.lt.s32.totalorder %s414_s26, %s414_s26 }
   0x6   :  { %p421_p3 = por %p420_p2, %p419_p1 }
   0x8   :  { %p422_p4 = pnand %p421_p3, %p415_p0 }
   0xa   :  { %425 = shalt.err (!%p422_p4)
}
   0xb   :  { %s451_s27 = smov 128   ;;  %s452_s28 = smov 8  }
   0xc   :  { %31 = dma.hbm_to_vmem [thread:$0]  %s603_s3, 3072, %s26_s25, [#allocation3], %s451_s27, %s451_s27, %s452_s28  }
   0xd   :  { %446 = dma.done.wait [#allocation3], 3072  }
   0xe   :  { %447 = vsyncadd [#allocation3], 4294964224  ;;  %v453_v0 = vmov 0.0   ;;  %v45_v1 = vld [vmem:[%s601_s1 + $0x18] sm:$0xff]  ;;  %v44_v2 = vld [vmem:[%s601_s1 + $0x10] sm:$0xff]  ;;  %vm58_vm0 = vcmask 130048   ;;  %v48_v39 = vlaneseq }
   0xf   :  { %126 = vmatprep.mubr.f32.mxu0 %v453_v0  ;;  %170 = vmatprep.subr.mxu1 %v453_v0  ;;  %v43_v3 = vld [vmem:[%s601_s1 + $0x8] sm:$0xff]  ;;  %v42_v4 = vld [vmem:[%s601_s1] sm:$0xff]  ;;  %v150_v5 = vld [vmem:[#allocation2 + $0x78] sm:$0xff]  ;;  %vm166_vm1 = vcmask 523264   ;;  %vm454_vm2 = vmmov 0   ;;  %vm260_vm3 = vcmask 785408  }
  0x10   :  { %90 = vmatprep.subr.mxu0 %v45_v1  ;;  %v41_v6 = vld [vmem:[%s600_s0] sm:$0xf]  ;;  %171 = vmatpush1.msra.mxu1 %v150_v5  ;;  %v149_v7 = vld [vmem:[#allocation2 + $0x70] sm:$0xff]  ;;  %v148_v8 = vld [vmem:[#allocation2 + $0x68] sm:$0xff]  ;;  %v49_v40 = vshrl.u32 %v48_v39, 7  ;;  %vm336_vm4 = vcmask 93184  }
  0x11   :  { %91 = vmatpush1.msra.mxu0 %v44_v2  ;;  %172 = vmatprep.subr.mxu1 %v453_v0  ;;  %v147_v9 = vld [vmem:[#allocation2 + $0x60] sm:$0xff]  ;;  %v146_v10 = vld [vmem:[#allocation2 + $0x58] sm:$0xff]  ;;  %v145_v11 = vld [vmem:[#allocation2 + $0x50] sm:$0xff] }
  0x12   :  { %92 = vmatprep.subr.mxu0 %v43_v3  ;;  %173 = vmatpush1.msra.mxu1 %v149_v7  ;;  %v144_v12 = vld [vmem:[#allocation2 + $0x48] sm:$0xff]  ;;  %v143_v13 = vld [vmem:[#allocation2 + $0x40] sm:$0xff]  ;;  %v142_v14 = vld [vmem:[#allocation2 + $0x38] sm:$0xff]  ;;  %v50_v41 = vsub.s32 0, %v49_v40  ;;  %v54_v43 = vsub.s32 1, %v49_v40 }
  0x13   :  { %93 = vmatpush1.msra.mxu0 %v42_v4  ;;  %174 = vmatprep.subr.mxu1 %v453_v0  ;;  %v141_v15 = vld [vmem:[#allocation2 + $0x30] sm:$0xff]  ;;  %v140_v16 = vld [vmem:[#allocation2 + $0x28] sm:$0xff]  ;;  %v139_v17 = vld [vmem:[#allocation2 + $0x20] sm:$0xff] }
  0x14   :  { %353 = vmatmul.mubr.msk.f32.vlgmr.msra.gmra.mxu0 %vm58_vm0, %v41_v6  ;;  %175 = vmatpush1.msra.mxu1 %v148_v8  ;;  %v138_v18 = vld [vmem:[#allocation2 + $0x18] sm:$0xff]  ;;  %v137_v19 = vld [vmem:[#allocation2 + $0x10] sm:$0xff]  ;;  %v136_v20 = vld [vmem:[#allocation2 + $0x8] sm:$0xff] }
  0x15   :  { %371 = vmatprep.subr.mxu0 %v453_v0  ;;  %176 = vmatprep.subr.mxu1 %v453_v0  ;;  %v135_v21 = vld [vmem:[#allocation2] sm:$0xff]  ;;  %v158_v22 = vld [vmem:[#allocation2 + $0xb8] sm:$0xff]  ;;  %v157_v23 = vld [vmem:[#allocation2 + $0xb0] sm:$0xff] }
  0x16   :  { %177 = vmatpush1.msra.mxu1 %v147_v9  ;;  %v156_v24 = vld [vmem:[#allocation2 + $0xa8] sm:$0xff]  ;;  %v155_v25 = vld [vmem:[#allocation2 + $0xa0] sm:$0xff]  ;;  %v154_v26 = vld [vmem:[#allocation2 + $0x98] sm:$0xff]  ;;  %395 = vmatprep.mubr.msk.f32.mxu0 %vm454_vm2, %v453_v0 }
  0x17   :  { %178 = vmatprep.subr.mxu1 %v453_v0  ;;  %v153_v27 = vld [vmem:[#allocation2 + $0x90] sm:$0xff]  ;;  %v152_v28 = vld [vmem:[#allocation2 + $0x88] sm:$0xff]  ;;  %v151_v29 = vld [vmem:[#allocation2 + $0x80] sm:$0xff] }
  0x18   :  { %179 = vmatpush1.msra.mxu1 %v146_v10  ;;  %v252_v30 = vld [vmem:[%s605_s5 + $0x58] sm:$0xff]  ;;  %v251_v31 = vld [vmem:[%s605_s5 + $0x50] sm:$0xff]  ;;  %v250_v32 = vld [vmem:[%s605_s5 + $0x48] sm:$0xff] }
  0x19   :  { %180 = vmatprep.subr.mxu1 %v453_v0  ;;  %372 = vmatpush3.msra.mxu0 %v252_v30  ;;  %v249_v33 = vld [vmem:[%s605_s5 + $0x40] sm:$0xff]  ;;  %v248_v34 = vld [vmem:[%s605_s5 + $0x38] sm:$0xff]  ;;  %v247_v35 = vld [vmem:[%s605_s5 + $0x30] sm:$0xff] }
  0x1a   :  { %181 = vmatpush1.msra.mxu1 %v145_v11  ;;  %373 = vmatprep.subr.mxu0 %v453_v0  ;;  %v246_v36 = vld [vmem:[%s605_s5 + $0x28] sm:$0xff]  ;;  %v245_v37 = vld [vmem:[%s605_s5 + $0x20] sm:$0xff]  ;;  %v244_v38 = vld [vmem:[%s605_s5 + $0x18] sm:$0xff] }
  0x1b   :  { %182 = vmatprep.subr.mxu1 %v453_v0  ;;  %374 = vmatpush3.msra.mxu0 %v251_v31  ;;  %v46_v42 = vld [vmem:[%s602_s2] sm:$0x3]  ;;  %v243_v52 = vld [vmem:[%s605_s5 + $0x10] sm:$0xff]  ;;  %v242_v53 = vld [vmem:[%s605_s5 + $0x8] sm:$0xff] }
  0x1c   :  { %183 = vmatpush1.msra.mxu1 %v144_v12  ;;  %375 = vmatprep.subr.mxu0 %v453_v0  ;;  %v51_v44 = vrot.slane %v46_v42, %v50_v41  ;;  %v55_v45 = vrot.slane %v46_v42, %v54_v43  ;;  %v241_v54 = vld [vmem:[%s605_s5] sm:$0xff]  ;;  %s455_s5 = smov [#allocation5]  }
  0x1d   :  { %184 = vmatprep.subr.mxu1 %v453_v0  ;;  %376 = vmatpush3.msra.mxu0 %v250_v32  ;;  %v354_v55 = vld [vmem:[%s604_s4] ss:$0 sm:$0xff]  ;;  %s344_s18 = sshll.u32 %s455_s5, 4  ;;  %s345_s18 = int_to_ptr.vmem [resolvable:$true] %s344_s18 }
  0x1e   :  { %185 = vmatpush1.msra.mxu1 %v143_v13  ;;  %377 = vmatprep.subr.mxu0 %v453_v0  ;;  %v356_v60 = vld [vmem:[%s606_s6] ss:$0 sm:$0xff]  ;;  %s426_s4 = scalar_lea.vmem %s345_s18, 64  ;;  %p431_p6 = scmp.lt.s32.totalorder %s345_s18, %s345_s18 }
  0x1f   :  { %186 = vmatprep.subr.mxu1 %v453_v0  ;;  %378 = vmatpush3.msra.mxu0 %v249_v33  ;;  %p427_p5 = scmp.ne.s32.totalorder %s345_s18, %s426_s4  ;;  %p432_p7 = scmp.lt.s32.totalorder %s426_s4, %s426_s4 }
  0x20   :  { %187 = vmatpush1.msra.mxu1 %v142_v14  ;;  %379 = vmatprep.subr.mxu0 %v453_v0 }
  0x21   :  { %188 = vmatprep.subr.mxu1 %v453_v0  ;;  %380 = vmatpush3.msra.mxu0 %v248_v34  ;;  %p433_p8 = por %p432_p7, %p431_p6 }
  0x22   :  { %189 = vmatpush1.msra.mxu1 %v141_v15  ;;  %381 = vmatprep.subr.mxu0 %v453_v0 }
  0x23   :  { %190 = vmatprep.subr.mxu1 %v453_v0  ;;  %382 = vmatpush3.msra.mxu0 %v247_v35  ;;  %p434_p9 = pnand %p433_p8, %p427_p5 }
  0x24   :  { %191 = vmatpush1.msra.mxu1 %v140_v16  ;;  %383 = vmatprep.subr.mxu0 %v453_v0 }
  0x25   :  { %192 = vmatprep.subr.mxu1 %v453_v0  ;;  %384 = vmatpush3.msra.mxu0 %v246_v36 }
  0x26   :  { %193 = vmatpush1.msra.mxu1 %v139_v17  ;;  %385 = vmatprep.subr.mxu0 %v453_v0 }
  0x27   :  { %194 = vmatprep.subr.mxu1 %v453_v0  ;;  %386 = vmatpush3.msra.mxu0 %v245_v37 }
  0x28   :  { %195 = vmatpush1.msra.mxu1 %v138_v18  ;;  %387 = vmatprep.subr.mxu0 %v453_v0 }
  0x29   :  { %196 = vmatprep.subr.mxu1 %v453_v0  ;;  %388 = vmatpush3.msra.mxu0 %v244_v38 }
  0x2a   :  { %197 = vmatpush1.msra.mxu1 %v137_v19  ;;  %389 = vmatprep.subr.mxu0 %v453_v0 }
  0x2b   :  { %198 = vmatprep.subr.mxu1 %v453_v0  ;;  %390 = vmatpush3.msra.mxu0 %v243_v52 }
  0x2c   :  { %199 = vmatpush1.msra.mxu1 %v136_v20  ;;  %391 = vmatprep.subr.mxu0 %v453_v0 }
  0x2d   :  { %200 = vmatprep.subr.mxu1 %v453_v0  ;;  %392 = vmatpush3.msra.mxu0 %v242_v53 }
  0x2e   :  { %201 = vmatpush1.msra.mxu1 %v135_v21  ;;  %393 = vmatprep.subr.mxu0 %v453_v0 }
  0x2f   :  { %218 = vmatprep.subr.mxu1 %v453_v0  ;;  %394 = vmatpush3.msra.mxu0 %v241_v54 }
  0x30   :  { %219 = vmatpush2.msra.mxu1 %v158_v22 }
  0x31   :  { %220 = vmatprep.subr.mxu1 %v453_v0 }
  0x32   :  { %221 = vmatpush2.msra.mxu1 %v157_v23 }
  0x33   :  { %222 = vmatprep.subr.mxu1 %v453_v0 }
  0x34   :  { %223 = vmatpush2.msra.mxu1 %v156_v24 }
  0x35   :  { %224 = vmatprep.subr.mxu1 %v453_v0 }
  0x36   :  { %225 = vmatpush2.msra.mxu1 %v155_v25 }
  0x37   :  { %226 = vmatprep.subr.mxu1 %v453_v0 }
  0x38   :  { %227 = vmatpush2.msra.mxu1 %v154_v26 }
  0x39   :  { %228 = vmatprep.subr.mxu1 %v453_v0 }
  0x3a   :  { %229 = vmatpush2.msra.mxu1 %v153_v27 }
  0x3b   :  { %230 = vmatprep.subr.mxu1 %v453_v0 }
  0x3c   :  { %231 = vmatpush2.msra.mxu1 %v152_v28 }
  0x3d   :  { %232 = vmatprep.subr.mxu1 %v453_v0 }
  0x3e   :  { %233 = vmatpush2.msra.mxu1 %v151_v29 }
  0xd4   :  { %v128_v46 = vpop.f32.mrf.mxu0 }
  0xd5   :  { %v129_v47 = vadd.f32 %v128_v46, %v51_v44 }
  0xd6   :  { %v130_v48 = vpop.f32.mrf.mxu0 }
  0xd7   :  { %v131_v49 = vadd.f32 %v130_v48, %v55_v45  ;;  %v133_v51 = vmax.f32 %v129_v47, 0.0 }
  0xd9   :  { %v134_v50 = vmax.f32 %v131_v49, 0.0 }
  0xdb   :  { %355 = vmatprep.mubr.msk.f32.mxu1 %vm166_vm1, %v134_v50 }
  0xdc   :  { %235 = vmatmul.mubr.f32.vlgmr.msra.gmra.mxu1 %v133_v51 }
 0x19c   :  { %v236_v56 = vpop.f32.mrf.mxu1 }
 0x19d   :  { %v237_v57 = vadd.f32 %v354_v55, %v236_v56 }
 0x19e   :  { %v238_v58 = vpop.f32.mrf.mxu1 }
 0x19f   :  { %v240_v59 = vmax.f32 %v237_v57, 0.0 }
 0x1a1   :  { %396 = vmatmul.mubr.msk.f32.vlgmr.msra.gmra.mxu0 %vm260_vm3, %v240_v59 }
 0x261   :  { %v330_v61 = vpop.f32.mrf.mxu0 }
 0x262   :  { %v331_v62 = vadd.f32 %v356_v60, %v330_v61 }
 0x263   :  { %v397_v63 = vpop.f32.mrf.mxu0 }
 0x264   :  { %404 = vtanh.f32 %v331_v62 }
 0x271   :  { %v405_v0 = vpop.eup %404 }
 0x272   :  { %v335_v1 = vmul.f32 2.0, %v405_v0 }
 0x274   :  { %337 = vst.msk [vmem:[#allocation5] sm:$0xf] %vm336_vm4, %v335_v1 }
 0x275   :  { %437 = shalt.err (!%p434_p9)
}
 0x276   :  { %347 = dma.vmem_to_hbm [thread:$0]  %s345_s18, 64, %s607_s7, [#allocation4]  }
 0x277   :  { %448 = dma.done.wait [#allocation4], 64  }
 0x278   :  { %449 = vsyncadd [#allocation4], 4294967232 }
 0x279   :  { %351 = vsyncpa [#allocation3], 1 }
 0x27a   :  { %352 = vsyncpa [#allocation4], 1 }

</bundles_post_ra>
